<compile_context>
chip_gen: v7x
topology: tpu7x:2x2x1
jax: 0.10.0
libtpu: 0.0.40
codegen_flags: <defaults>
</compile_context>

<pallas_src>
import jax
import jax.numpy as jnp
from jax import lax
from jax.experimental import pallas as pl
from jax.experimental.pallas import tpu as pltpu


# ---------------------------------------------------------------------------
# Kernel (built per shape/dtype configuration)
# ---------------------------------------------------------------------------
def _identity_for_min(dtype):
    if jnp.issubdtype(dtype, jnp.floating):
        return jnp.array(jnp.inf, dtype=dtype)
    return jnp.array(jnp.iinfo(dtype).max, dtype=dtype)


def _make_min_pool_kernel(T, sub, use_fold, need_mask):
    def kernel(x_ref, o_ref, acc_ref):
        tb, tt, th = x_ref.shape
        x = x_ref[...]

        if need_mask:
            # Tail T block extends past T: neutralize padded rows before min.
            t0 = pl.program_id(2) * tt
            t_ids = lax.broadcasted_iota(jnp.int32, (tt, th), 0)
            valid = (t0 + t_ids) < T
            x = jnp.where(valid[None, :, :], x, _identity_for_min(x.dtype))

        if use_fold:
            # (tb, tt, th) -> (tb, G, sub, th); reduce over G is pure VPU vmin
            # between vregs (no XLU sublane reduce in the steady-state loop).
            chunk = jnp.min(x.reshape(tb, tt // sub, sub, th), axis=1)
        else:
            # Single tiny block with T < sub: plain sublane reduce once.
            chunk = jnp.min(x, axis=1, keepdims=True)

        t = pl.program_id(2)

        @pl.when(t == 0)
        def _init():
            acc_ref[...] = chunk

        @pl.when(t != 0)
        def _fold():
            acc_ref[...] = jnp.minimum(acc_ref[...], chunk)

        @pl.when(t == pl.num_programs(2) - 1)
        def _finalize():
            # One XLU sublane reduce per output tile, on the last step only.
            o_ref[...] = jnp.min(acc_ref[...], axis=1)

    return kernel


# ---------------------------------------------------------------------------
# Trace-time helpers
# ---------------------------------------------------------------------------
_MIN_ELEMS_FOR_PALLAS = 8 * 8 * 128   # below this, XLA's fused reduce wins


def _tpu_vmem_capacity():
    try:
        info = pltpu.get_tpu_info()
        cap = getattr(info, "vmem_capacity_bytes", None)
        if cap:
            return int(cap)
    except Exception:
        pass
    return None


def _pick_th(H, tb, sub, itemsize, budget):
    """Largest multiple of 128 dividing H such that the minimal (tb, sub, th)
    block fits the per-buffer budget.  Prefer th == H (contiguous DMA)."""
    n128 = H // 128
    max_k = budget // (itemsize * tb * sub * 128)
    if max_k >= n128:
        return H
    best = None
    for k in range(1, min(n128, int(max_k)) + 1):
        if n128 % k == 0:
            best = k
    return None if best is None else 128 * best


# ---------------------------------------------------------------------------
# Pallas path
# ---------------------------------------------------------------------------
def _min_pooling_pallas(x, tb, tt, th, sub, use_fold, need_mask, vmem_limit):
    B, T, H = x.shape
    itemsize = jnp.dtype(x.dtype).itemsize
    grid = (B // tb, H // th, pl.cdiv(T, tt))
    acc_rows = sub if use_fold else 1

    return pl.pallas_call(
        _make_min_pool_kernel(T, sub, use_fold, need_mask),
        out_shape=jax.ShapeDtypeStruct((B, H), x.dtype),
        grid_spec=pltpu.PrefetchScalarGridSpec(
            num_scalar_prefetch=0,
            grid=grid,
            in_specs=[pl.BlockSpec((tb, tt, th), lambda b, h, t: (b, t, h))],
            # Block index constant over t -> output tile stays VMEM-resident
            # across the reduction axis.
            out_specs=pl.BlockSpec((tb, th), lambda b, h, t: (b, h)),
            scratch_shapes=[pltpu.VMEM((tb, acc_rows, th), x.dtype)],
        ),
        compiler_params=pltpu.CompilerParams(
            dimension_semantics=("parallel", "parallel", "arbitrary"),
            vmem_limit_bytes=vmem_limit,
        ),
        cost_estimate=pl.CostEstimate(
            flops=B * T * H,
            transcendentals=0,
            bytes_accessed=(B * T * H + B * H) * itemsize,
        ),
    )(x)


# ---------------------------------------------------------------------------
# Public wrapper — same semantics as torch.min(x, dim=1).values
# ---------------------------------------------------------------------------
def min_pooling(x: jax.Array, *, _per_buffer_budget_bytes=None) -> jax.Array:
    if x.ndim != 3:
        # torch.min(x, dim=1).values works for any rank >= 2; the tuned Pallas
        # path targets the (B, T, H) layout, everything else goes to XLA.
        return jnp.min(x, axis=1)

    B, T, H = x.shape
    dtype = x.dtype
    itemsize = jnp.dtype(dtype).itemsize

    is_float = jnp.issubdtype(dtype, jnp.floating)
    is_int = jnp.issubdtype(dtype, jnp.integer)
    supported = (is_float and itemsize in (2, 4)) or (is_int and itemsize in (1, 2, 4))

    # Tiny or lane-unaligned problems: launch/grid overhead and masked stores
    # dominate — plain jnp.min is both correct and faster there.
    if (not supported) or H % 128 != 0 or x.size < _MIN_ELEMS_FOR_PALLAS:
        return jnp.min(x, axis=1)

    # Sublane pack factor for the dtype (f32: 8, bf16/f16: 16, int8: 32).
    sub = {1: 32, 2: 16, 4: 8}[itemsize]

    # Generation-aware VMEM budgets.
    vmem_cap = _tpu_vmem_capacity()
    if vmem_cap is not None and vmem_cap <= 64 * 1024 * 1024:
        # v7x-class: 64 MiB physical VMEM, 2 TensorCores, 3.2 TB/s HBM.
        vmem_limit = min(48 * 1024 * 1024, vmem_cap * 3 // 4)
        budget = 10 * 1024 * 1024
        small_vmem = True
    elif vmem_cap is None:
        # Unknown generation: conservative settings that are safe everywhere.
        vmem_limit = 48 * 1024 * 1024
        budget = 10 * 1024 * 1024
        small_vmem = False
    else:
        # v5e/v6e: 128 MiB physical VMEM (raise the 16/32 MiB scoped default).
        vmem_limit = min(80 * 1024 * 1024, vmem_cap * 3 // 4)
        budget = 16 * 1024 * 1024
        small_vmem = False
    if _per_buffer_budget_bytes is not None:      # test hook
        budget = int(_per_buffer_budget_bytes)

    # Batch tile: a full packed native tile when possible (unmasked stores).
    if B % sub == 0:
        tb = sub
    elif B % 8 == 0:
        tb = 8
    elif B <= 256:
        tb = B                        # full-extent block is always legal
    else:
        # Rare awkward batch (large, not a multiple of 8): XLA reduce.
        return jnp.min(x, axis=1)

    # H tile: prefer full H -> fully contiguous (b, t-chunk) DMA slabs.
    th = _pick_th(H, tb, sub, itemsize, budget)
    if th is None:
        return jnp.min(x, axis=1)

    # v7x megacore: guarantee >= 2 blocks on the parallel axes so both
    # TensorCores get work (irrelevant on single-TC v5e/v6e).
    if small_vmem and (B // tb) * (H // th) < 2 and th == H:
        n128 = H // 128
        for p in range(2, n128 + 1):
            if n128 % p == 0:
                th = H // p
                break

    # T tile: as large as the per-buffer budget allows, multiple of `sub`,
    # reduction axis last in the grid with +inf masking for a ragged tail.
    tt_rows = budget // (itemsize * tb * th)
    if T < sub:
        tt, use_fold, need_mask = T, False, False          # one tiny block
    elif T <= tt_rows and T % sub == 0:
        tt, use_fold, need_mask = T, True, False           # one aligned block
    else:
        tt = max(sub, (min(T, tt_rows) // sub) * sub)
        use_fold = True
        need_mask = (T % tt) != 0

    return _min_pooling_pallas(x, tb, tt, th, sub, use_fold, need_mask, vmem_limit)


if __name__ == "__main__":
    key = jax.random.PRNGKey(0)
    k1, k2, k3, k4 = jax.random.split(key, 4)

    # 1) Canonical tiny shape from the module spec — exercises the dispatch
    #    fallback (H % 128 != 0; same semantics, Pallas skipped on purpose).
    x1 = jax.random.normal(k1, (2, 8, 32), dtype=jnp.float32)
    y1 = min_pooling(x1)
    jax.block_until_ready(y1)
    assert y1.shape == (2, 32)
    assert jnp.array_equal(y1, jnp.min(x1, axis=1))

    # 2) Aligned f32 shape exercising the Pallas path: single contiguous
    #    T chunk, VPU fold + one final sublane reduce, th = H.
    x2 = jax.random.normal(k2, (16, 64, 128), dtype=jnp.float32)
    y2 = min_pooling(x2)
    jax.block_until_ready(y2)
    assert y2.shape == (16, 128)
    assert jnp.array_equal(y2, jnp.min(x2, axis=1))

    # 3) Non-divisible T with a tiny forced budget: multi-step accumulator,
    #    cdiv grid and +inf tail masking (grid_t = 13, 4-row ragged tail).
    x3 = jax.random.normal(k3, (8, 100, 128), dtype=jnp.float32)
    y3 = min_pooling(x3, _per_buffer_budget_bytes=32 * 1024)
    jax.block_until_ready(y3)
    assert y3.shape == (8, 128)
    assert jnp.array_equal(y3, jnp.min(x3, axis=1))

    # 4) bf16: dtype-aware sublane packing (sub = tb = 16).
    x4 = jax.random.normal(k4, (16, 64, 128), dtype=jnp.bfloat16)
    y4 = min_pooling(x4)
    jax.block_until_ready(y4)
    assert y4.shape == (16, 128)
    assert jnp.array_equal(y4, jnp.min(x4, axis=1))

    print("KERNEL_OK")
</pallas_src>

<mosaic_0001>
module attributes {stable_mosaic.version = 11 : i64} {
  func.func @kernel(%arg0: i32, %arg1: i32, %arg2: i32, %arg3: memref<8x64x128xf32, #tpu.memory_space<vmem>>, %arg4: memref<8x128xf32, #tpu.memory_space<vmem>>, %arg5: memref<8x8x128xf32, #tpu.memory_space<vmem>>) attributes {dimension_semantics = [#tpu.dimension_semantics<parallel>, #tpu.dimension_semantics<parallel>, #tpu.dimension_semantics<arbitrary>], iteration_bounds = array<i64: 2, 1, 1>, scalar_prefetch = 0 : i64, scratch_operands = 1 : i64, tpu.core_type = #tpu.core_type<tc>, window_params = [{transform_indices = @transform_0, window_bounds = array<i64: 8, 64, 128>}, {transform_indices = @transform_1, window_bounds = array<i64: 8, 128>}]} {
    %c0 = arith.constant 0 : index
    %c0_0 = arith.constant 0 : index
    %c0_1 = arith.constant 0 : index
    %0 = vector.load %arg3[%c0, %c0_0, %c0_1] : memref<8x64x128xf32, #tpu.memory_space<vmem>>, vector<8x64x128xf32>
    %1 = vector.shape_cast %0 : vector<8x64x128xf32> to vector<8x8x8x128xf32>
    %cst = arith.constant dense<0x7F800000> : vector<8x8x128xf32>
    %2 = vector.multi_reduction <minimumf>, %1, %cst [1] : vector<8x8x8x128xf32> to vector<8x8x128xf32>
    %c0_i32 = arith.constant 0 : i32
    %3 = arith.cmpi eq, %arg2, %c0_i32 : i32
    %4 = arith.extui %3 : i1 to i32
    %c0_i32_2 = arith.constant 0 : i32
    %5 = arith.cmpi ne, %4, %c0_i32_2 : i32
    scf.if %5 {
      %c0_7 = arith.constant 0 : index
      %c0_8 = arith.constant 0 : index
      %c0_9 = arith.constant 0 : index
      %12 = vector.load %arg5[%c0_7, %c0_8, %c0_9] : memref<8x8x128xf32, #tpu.memory_space<vmem>>, vector<8x8x128xf32>
      tpu.vector_store %arg5[%c0_7, %c0_8, %c0_9], %2 {strides = array<i32>} : memref<8x8x128xf32, #tpu.memory_space<vmem>>, vector<8x8x128xf32>,
    } else {
    }
    %c0_i32_3 = arith.constant 0 : i32
    %6 = arith.cmpi ne, %arg2, %c0_i32_3 : i32
    %7 = arith.extui %6 : i1 to i32
    %c0_i32_4 = arith.constant 0 : i32
    %8 = arith.cmpi ne, %7, %c0_i32_4 : i32
    scf.if %8 {
      %c0_7 = arith.constant 0 : index
      %c0_8 = arith.constant 0 : index
      %c0_9 = arith.constant 0 : index
      %12 = vector.load %arg5[%c0_7, %c0_8, %c0_9] : memref<8x8x128xf32, #tpu.memory_space<vmem>>, vector<8x8x128xf32>
      %13 = arith.minimumf %12, %2 : vector<8x8x128xf32>
      %c0_10 = arith.constant 0 : index
      %c0_11 = arith.constant 0 : index
      %c0_12 = arith.constant 0 : index
      %14 = vector.load %arg5[%c0_10, %c0_11, %c0_12] : memref<8x8x128xf32, #tpu.memory_space<vmem>>, vector<8x8x128xf32>
      tpu.vector_store %arg5[%c0_10, %c0_11, %c0_12], %13 {strides = array<i32>} : memref<8x8x128xf32, #tpu.memory_space<vmem>>, vector<8x8x128xf32>,
    } else {
    }
    %c0_i32_5 = arith.constant 0 : i32
    %9 = arith.cmpi eq, %arg2, %c0_i32_5 : i32
    %10 = arith.extui %9 : i1 to i32
    %c0_i32_6 = arith.constant 0 : i32
    %11 = arith.cmpi ne, %10, %c0_i32_6 : i32
    scf.if %11 {
      %c0_7 = arith.constant 0 : index
      %c0_8 = arith.constant 0 : index
      %c0_9 = arith.constant 0 : index
      %12 = vector.load %arg5[%c0_7, %c0_8, %c0_9] : memref<8x8x128xf32, #tpu.memory_space<vmem>>, vector<8x8x128xf32>
      %cst_10 = arith.constant dense<0x7F800000> : vector<8x128xf32>
      %13 = vector.multi_reduction <minimumf>, %12, %cst_10 [1] : vector<8x8x128xf32> to vector<8x128xf32>
      %c0_11 = arith.constant 0 : index
      %c0_12 = arith.constant 0 : index
      %14 = vector.load %arg4[%c0_11, %c0_12] : memref<8x128xf32, #tpu.memory_space<vmem>>, vector<8x128xf32>
      tpu.vector_store %arg4[%c0_11, %c0_12], %13 {strides = array<i32>} : memref<8x128xf32, #tpu.memory_space<vmem>>, vector<8x128xf32>,
    } else {
    }
    return
  }
  func.func @transform_0(%arg0: i32, %arg1: i32, %arg2: i32) -> (i32, i32, i32) {
    %c0_i32 = arith.constant 0 : i32
    return %arg0, %arg2, %arg1 : i32, i32, i32
  }
  func.func @transform_1(%arg0: i32, %arg1: i32, %arg2: i32) -> (i32, i32) {
    %c0_i32 = arith.constant 0 : i32
    return %arg0, %arg1 : i32, i32
  }
}

</mosaic_0001>

<bundles_post_ra>
// kernel: tpu_custom_call.1
= control target key start
LH: loop header
LB: loop body
LE: loop exit
PB: predicated region body
PF: predicated region fallthrough
CT: control target
= control target key end

     0   :  { %6 = vsyncpa [#allocation4], 0  ;;  %s959_s0 = inlined_call_operand.hbm [shape: f32[16,64,128], index: 0, kind: input, shape index: {}]   ;;  %s960_s1 = inlined_call_operand.hbm [shape: f32[16,128], index: 1, kind: output, shape index: {}]  }
   0x1   :  { %8 = vsyncpa [#allocation4 + $0x1], 0 }
   0x2   :  { %9 = vsyncpa [#allocation5], 0 }
   0x3   :  { %11 = vsyncpa [#allocation5 + $0x1], 0  ;;  %s719_s6 = smov 0   ;;  %s721_s7 = smov 0  }
   0x4   :  { %s723_s8 = smov 0   ;;  %s725_s9 = smov 0  }
   0x5   :  { %s727_s10 = smov 0   ;;  %s729_s11 = smov 0  }
   0x6 LB: > { %s510_s12 = sadd.s32 4294967295, %s703_s11   ;;  %s511_s13 = sadd.s32 4294967294, %s703_s11   ;;  %s703_s11 = sphi %s729_s11, %s17_s11   ;;  %s699_s10 = sphi %s727_s10, %s975_s10   ;;  %s695_s9 = sphi %s725_s9, %s974_s9   ;;  %s691_s8 = sphi %s723_s8, %s973_s8   ;;  %s687_s7 = sphi %s721_s7, %s972_s7   ;;  %s683_s6 = sphi %s719_s6, %s971_s6  }
   0x7   : > { %s36_s14 = sadd.s32 1, %s699_s10  ;;  %s47_s15 = sadd.s32 1, %s691_s8 }
   0x8   : > { %p38_p0 = scmp.ge.s32.totalorder %s36_s14, 2  ;;  %p54_p1 = scmp.ne.s32.totalorder %s691_s8, %s687_s7 }
   0x9   : > { %p55_p2 = scmp.eq.s32.totalorder %s703_s11, 0  ;;  %p60_p3 = scmp.ne.s32.totalorder %s687_s7, %s683_s6 }
   0xa   : > { %s977_s14 = smov (%p38_p0, %s36_s14), 0  ;;  %p61_p5 = scmp.eq.s32.totalorder %s510_s12, 0 }
   0xb   : > { %p760_p4 = por %p55_p2, %p54_p1  ;;  %s40_s17 = ssub.s32 %s699_s10, %s977_s14 }
   0xc   : > { %p86_p6 = scmp.eq.s32.totalorder %s510_s12, 1  ;;  %p45_p7 = scmp.eq.s32.totalorder %s40_s17, 0 }
   0xd   : > { %p766_p8 = por %p61_p5, %p60_p3  ;;  %p92_p10 = scmp.eq.s32.totalorder %s511_s13, 1 }
   0xe   : > { %p770_p9 = por %p86_p6, %p54_p1  ;;  %p539_p13 = scmp.lt.s32.totalorder %s703_s11, 2 }
   0xf   : > { %s775_s20 = scalar_select %p45_p7, %s691_s8, %s47_s15  }
  0x10   : > { %s964_s19 = scalar_select %p770_p9, 1, 0 }
  0x11   : > { %p777_p11 = por %p92_p10, %p60_p3  ;;  %s112_s22 = sand.u32 1, %s691_s8  }
  0x12   : > { %s514_s23 = sshll.u32 %s112_s22, 9  ;;  %s526_s24 = sshll.u32 %s699_s10, 13 }
  0x13   : > { %s965_s21 = scalar_select %p777_p11, 1, 0 }
  0x14   : > { %s788_s27 = scalar_lea.hbm %s959_s0, %s526_s24  ;;  %s116_s28 = scalar_lea.vmem [#allocation3], %s514_s23 }
  0x15   : > { %s127_s29 = sshll.u32 %s116_s28, 4  ;;  %p794_p0 = pnand %p539_p13, %p760_p4  ;;  %s790_s29 = int_to_ptr.vmem [resolvable:$true] %s127_s29 }
  0x16   : > { %s799_s2 = scalar_lea.sflag [#allocation4], %s112_s22  ;;  %s591_s3 = scalar_lea.hbm %s788_s27, 8192 }
  0x17   : > { %p592_p2 = scmp.ne.s32.totalorder %s788_s27, %s591_s3  ;;  %p593_p3 = pneg %p794_p0 }
  0x18   : > { %s596_s12 = scalar_lea.hbm %s959_s0, 16384  ;;  %p597_p4 = scmp.lt.u32.totalorder %s788_s27, %s959_s0 }
  0x19   : > { %p594_p5 = pnand %p593_p3, %p592_p2  ;;  %p598_p7 = scmp.lt.u32.totalorder %s596_s12, %s591_s3 }
  0x1a   : > { %p600_p13 = scmp.lt.u32.totalorder %s591_s3, %s788_s27 }
  0x1b   : > { %p595_p6 = pneg %p594_p5  ;;  %p599_p10 = por %p598_p7, %p597_p4 }
  0x1d   : > { %p601_p12 = por %p600_p13, %p599_p10 }
  0x1f   : > { %p602_p1 = pnand %p601_p12, %p595_p6 }
  0x21   : > { %605 = shalt.err (!%p602_p1)
}
  0x22   : > { %s606_s16 = scalar_lea.vmem %s790_s29, 8192  ;;  %s705_s17 = smov [#allocation3]  }
  0x23   : > { %p607_p2 = scmp.ne.s32.totalorder %s790_s29, %s606_s16  ;;  %s611_s22 = sshll.u32 %s705_s17, 4  ;;  %s612_s22 = int_to_ptr.vmem [resolvable:$false] %s611_s22 }
  0x24   : > { %s613_s23 = scalar_lea.vmem %s612_s22, 16384  ;;  %p614_p9 = scmp.lt.s32.totalorder %s790_s29, %s612_s22 }
  0x25   : > { %p609_p5 = pnand %p607_p2, %p593_p3  ;;  %p615_p4 = scmp.lt.s32.totalorder %s613_s23, %s606_s16 }
  0x27   : > { %p610_p11 = pneg %p609_p5  ;;  %p616_p7 = por %p615_p4, %p614_p9 }
  0x29   : > { %p617_p10 = pnand %p616_p7, %p610_p11 }
  0x2b   : > { %620 = shalt.err (!%p617_p10)
}
  0x2c   : > { %s706_s24 = smov 128   ;;  %s707_s25 = smov 8  }
  0x2d   : > { %534 = dma.hbm_to_vmem [thread:$0]  (!%p794_p0), %s788_s27, 8192, %s790_s29, %s799_s2, %s706_s24, %s706_s24, %s707_s25  }
  0x2e   : > { %p135_p12 = scmp.lt.s32.totalorder %s703_s11, 3  ;;  %p967_p1 = scmp.ge.s32.totalorder %s703_s11, 1 }
  0x30   : > { %p136_p3 = pnand %p967_p1, %p135_p12 }
  0x31   : > { %s831_s26 = sand.u32 (!%p136_p3), 1, %s687_s7  }
  0x32   : > { %139 = sbr.rel (%p136_p3) target bundleno = 117 (0x75), region = 24  ;;  %s519_s28 = sshll.u32 (!%p136_p3), %s831_s26, 9 }
  0x33   : > { %s142_s3 = scalar_lea.sflag (!%p136_p3), [#allocation4], %s831_s26  ;;  %s835_s4 = scalar_lea.vmem (!%p136_p3), [#allocation3], %s519_s28 }
  0x39   : > { %674 = dma.done.wait (%p766_p8), %s142_s3, 8192  }
  0x3a   : > { %676 = vsyncadd (%p766_p8), %s142_s3, 4294959104  ;;  %v166_v0 = vld [vmem:[%s835_s4] sm:$0xff]  ;;  %v167_v1 = vld [vmem:[%s835_s4 + $0x8] sm:$0xff]  ;;  %vm393_vm0 = vcmask 1041409   ;;  %vm395_vm1 = vcmask 1042434   ;;  %vm397_vm2 = vcmask 1043459  }
  0x3b   : > { %v168_v2 = vld [vmem:[%s835_s4 + $0x10] sm:$0xff]  ;;  %v230_v3 = vmin.f32 %v166_v0, %v167_v1  ;;  %v169_v4 = vld [vmem:[%s835_s4 + $0x18] sm:$0xff]  ;;  %v174_v5 = vld [vmem:[%s835_s4 + $0x40] sm:$0xff]  ;;  %vm399_vm3 = vcmask 1044484   ;;  %s520_s18 = sshll.u32 %s831_s26, 3  ;;  %vm401_vm4 = vcmask 1045509  }
  0x3c   : > { %v175_v6 = vld [vmem:[%s835_s4 + $0x48] sm:$0xff]  ;;  %v176_v7 = vld [vmem:[%s835_s4 + $0x50] sm:$0xff]  ;;  %v170_v9 = vld [vmem:[%s835_s4 + $0x20] sm:$0xff]  ;;  %vm403_vm5 = vcmask 1046534   ;;  %s163_s27 = scalar_lea.vmem [#allocation6], %s520_s18  ;;  %s522_s30 = sshll.u32 %s695_s9, 7 }
  0x3d   : > { %v231_v8 = vmin.f32 %v230_v3, %v168_v2  ;;  %v237_v10 = vmin.f32 %v174_v5, %v175_v6  ;;  %v177_v11 = vld [vmem:[%s835_s4 + $0x58] sm:$0xff]  ;;  %v182_v12 = vld [vmem:[%s835_s4 + $0x80] sm:$0xff]  ;;  %v183_v13 = vld [vmem:[%s835_s4 + $0x88] sm:$0xff]  ;;  %s424_s29 = sshll.u32 %s163_s27, 4  ;;  %vm405_vm6 = vcmask 1047559   ;;  %s912_s12 = scalar_lea.hbm %s960_s1, %s522_s30  ;;  %s907_s29 = int_to_ptr.vmem [resolvable:$true] %s424_s29 }
  0x3e   : > { %v171_v15 = vld [vmem:[%s835_s4 + $0x28] sm:$0xff]  ;;  %v184_v16 = vld [vmem:[%s835_s4 + $0x90] sm:$0xff]  ;;  %v244_v18 = vmin.f32 %v182_v12, %v183_v13  ;;  %v178_v20 = vld [vmem:[%s835_s4 + $0x60] sm:$0xff]  ;;  %s410_s13 = scalar_lea.sflag [#allocation5], %s831_s26  ;;  %s621_s15 = scalar_lea.vmem %s907_s29, 128 }
  0x3f   : > { %v232_v14 = vmin.f32 %v231_v8, %v169_v4  ;;  %v238_v17 = vmin.f32 %v237_v10, %v176_v7  ;;  %v172_v19 = vld [vmem:[%s835_s4 + $0x30] sm:$0xff]  ;;  %v185_v21 = vld [vmem:[%s835_s4 + $0x98] sm:$0xff]  ;;  %v190_v23 = vld [vmem:[%s835_s4 + $0xc0] sm:$0xff]  ;;  %p622_p8 = scmp.ne.s32.totalorder %s907_s29, %s621_s15  ;;  %p968_p9 = scmp.ne.s32.totalorder %s964_s19, 0 }
  0x40   : > { %v191_v24 = vld [vmem:[%s835_s4 + $0xc8] sm:$0xff]  ;;  %v192_v25 = vld [vmem:[%s835_s4 + $0xd0] sm:$0xff]  ;;  %v245_v27 = vmin.f32 %v244_v18, %v184_v16  ;;  %v173_v28 = vld [vmem:[%s835_s4 + $0x38] sm:$0xff]  ;;  %s708_s9 = smov [#allocation6]  }
  0x41   : > { %v233_v22 = vmin.f32 %v232_v14, %v170_v9  ;;  %v239_v26 = vmin.f32 %v238_v17, %v177_v11  ;;  %v179_v29 = vld [vmem:[%s835_s4 + $0x68] sm:$0xff]  ;;  %v186_v30 = vld [vmem:[%s835_s4 + $0xa0] sm:$0xff]  ;;  %v251_v32 = vmin.f32 %v190_v23, %v191_v24  ;;  %v180_v33 = vld [vmem:[%s835_s4 + $0x70] sm:$0xff]  ;;  %p623_p11 = pnand %p622_p8, %p968_p9  ;;  %s625_s16 = sshll.u32 %s708_s9, 4  ;;  %s626_s16 = int_to_ptr.vmem [resolvable:$false] %s625_s16 }
  0x42   : > { %v193_v34 = vld [vmem:[%s835_s4 + $0xd8] sm:$0xff]  ;;  %v198_v35 = vld [vmem:[%s835_s4 + $0x100] sm:$0xff]  ;;  %v246_v37 = vmin.f32 %v245_v27, %v185_v21  ;;  %v187_v38 = vld [vmem:[%s835_s4 + $0xa8] sm:$0xff]  ;;  %s627_s17 = scalar_lea.vmem %s626_s16, 256  ;;  %p628_p6 = scmp.lt.s32.totalorder %s907_s29, %s626_s16 }
  0x43   : > { %v234_v31 = vmin.f32 %v233_v22, %v171_v15  ;;  %v240_v36 = vmin.f32 %v239_v26, %v178_v20  ;;  %v199_v39 = vld [vmem:[%s835_s4 + $0x108] sm:$0xff]  ;;  %v200_v40 = vld [vmem:[%s835_s4 + $0x110] sm:$0xff]  ;;  %v252_v42 = vmin.f32 %v251_v32, %v192_v25  ;;  %v181_v43 = vld [vmem:[%s835_s4 + $0x78] sm:$0xff]  ;;  %p624_p0 = pneg %p623_p11  ;;  %p629_p13 = scmp.lt.s32.totalorder %s627_s17, %s621_s15 }
  0x44   : > { %v188_v44 = vld [vmem:[%s835_s4 + $0xb0] sm:$0xff]  ;;  %v194_v45 = vld [vmem:[%s835_s4 + $0xe0] sm:$0xff]  ;;  %v247_v47 = vmin.f32 %v246_v37, %v186_v30  ;;  %v258_v48 = vmin.f32 %v198_v35, %v199_v39  ;;  %v201_v49 = vld [vmem:[%s835_s4 + $0x118] sm:$0xff] }
  0x45   : > { %v235_v41 = vmin.f32 %v234_v31, %v172_v19  ;;  %v241_v46 = vmin.f32 %v240_v36, %v179_v29  ;;  %v206_v50 = vld [vmem:[%s835_s4 + $0x140] sm:$0xff]  ;;  %v207_v51 = vld [vmem:[%s835_s4 + $0x148] sm:$0xff]  ;;  %v253_v53 = vmin.f32 %v252_v42, %v193_v34  ;;  %v189_v54 = vld [vmem:[%s835_s4 + $0xb8] sm:$0xff]  ;;  %p630_p2 = por %p629_p13, %p628_p6 }
  0x46   : > { %v195_v55 = vld [vmem:[%s835_s4 + $0xe8] sm:$0xff]  ;;  %v208_v56 = vld [vmem:[%s835_s4 + $0x150] sm:$0xff]  ;;  %v248_v58 = vmin.f32 %v247_v47, %v187_v38  ;;  %v259_v59 = vmin.f32 %v258_v48, %v200_v40  ;;  %v265_v60 = vmin.f32 %v206_v50, %v207_v51  ;;  %v202_v62 = vld [vmem:[%s835_s4 + $0x120] sm:$0xff] }
  0x47   : > { %v236_v52 = vmin.f32 %v235_v41, %v173_v28  ;;  %v242_v57 = vmin.f32 %v241_v46, %v180_v33  ;;  %v196_v61 = vld [vmem:[%s835_s4 + $0xf0] sm:$0xff]  ;;  %v209_v63 = vld [vmem:[%s835_s4 + $0x158] sm:$0xff]  ;;  %v254_v0 = vmin.f32 %v253_v53, %v194_v45  ;;  %v214_v2 = vld [vmem:[%s835_s4 + $0x180] sm:$0xff]  ;;  %p631_p5 = pnand %p630_p2, %p624_p0 }
  0x48   : > { %v215_v3 = vld [vmem:[%s835_s4 + $0x188] sm:$0xff]  ;;  %v216_v4 = vld [vmem:[%s835_s4 + $0x190] sm:$0xff]  ;;  %v249_v6 = vmin.f32 %v248_v58, %v188_v44  ;;  %v260_v7 = vmin.f32 %v259_v59, %v201_v49  ;;  %v266_v8 = vmin.f32 %v265_v60, %v208_v56  ;;  %v197_v9 = vld [vmem:[%s835_s4 + $0xf8] sm:$0xff] }
  0x49   : > { %v337_v1 = vrot.slane %v236_v52, 4  ;;  %v243_v5 = vmin.f32 %v242_v57, %v181_v43  ;;  %v203_v10 = vld [vmem:[%s835_s4 + $0x128] sm:$0xff]  ;;  %v210_v11 = vld [vmem:[%s835_s4 + $0x160] sm:$0xff]  ;;  %v255_v12 = vmin.f32 %v254_v0, %v195_v55  ;;  %v272_v13 = vmin.f32 %v214_v2, %v215_v3  ;;  %v204_v15 = vld [vmem:[%s835_s4 + $0x130] sm:$0xff] }
  0x4a   : > { %v217_v16 = vld [vmem:[%s835_s4 + $0x198] sm:$0xff]  ;;  %v222_v17 = vld [vmem:[%s835_s4 + $0x1c0] sm:$0xff]  ;;  %v250_v18 = vmin.f32 %v249_v6, %v189_v54  ;;  %v261_v19 = vmin.f32 %v260_v7, %v202_v62  ;;  %v267_v20 = vmin.f32 %v266_v8, %v209_v63  ;;  %v211_v22 = vld [vmem:[%s835_s4 + $0x168] sm:$0xff] }
  0x4b   : > { %v338_v14 = vmin.f32 %v236_v52, %v337_v1  ;;  %v343_v21 = vrot.slane %v243_v5, 4  ;;  %v223_v23 = vld [vmem:[%s835_s4 + $0x1c8] sm:$0xff]  ;;  %v224_v24 = vld [vmem:[%s835_s4 + $0x1d0] sm:$0xff]  ;;  %v256_v25 = vmin.f32 %v255_v12, %v196_v61  ;;  %v273_v26 = vmin.f32 %v272_v13, %v216_v4  ;;  %v218_v28 = vld [vmem:[%s835_s4 + $0x1a0] sm:$0xff] }
  0x4c   : > { %v262_v29 = vmin.f32 %v261_v19, %v203_v10  ;;  %v268_v30 = vmin.f32 %v267_v20, %v210_v11  ;;  %v279_v31 = vmin.f32 %v222_v17, %v223_v23  ;;  %v205_v33 = vld [vmem:[%s835_s4 + $0x138] sm:$0xff]  ;;  %v212_v34 = vld [vmem:[%s835_s4 + $0x170] sm:$0xff]  ;;  %v349_v39 = vrot.slane %v250_v18, 4  ;;  %v219_v40 = vld [vmem:[%s835_s4 + $0x1a8] sm:$0xff] }
  0x4d   : > { %v339_v27 = vrot.slane %v338_v14, 2  ;;  %v344_v32 = vmin.f32 %v243_v5, %v343_v21  ;;  %v225_v35 = vld [vmem:[%s835_s4 + $0x1d8] sm:$0xff]  ;;  %v257_v36 = vmin.f32 %v256_v25, %v197_v9  ;;  %v274_v37 = vmin.f32 %v273_v26, %v217_v16  ;;  %v226_v46 = vld [vmem:[%s835_s4 + $0x1e0] sm:$0xff]  ;;  %v220_v51 = vld [vmem:[%s835_s4 + $0x1b0] sm:$0xff] }
  0x4e   : > { %v263_v41 = vmin.f32 %v262_v29, %v204_v15  ;;  %v269_v42 = vmin.f32 %v268_v30, %v211_v22  ;;  %v280_v43 = vmin.f32 %v279_v31, %v224_v24  ;;  %v213_v45 = vld [vmem:[%s835_s4 + $0x178] sm:$0xff]  ;;  %v350_v49 = vmin.f32 %v250_v18, %v349_v39  ;;  %v227_v56 = vld [vmem:[%s835_s4 + $0x1e8] sm:$0xff]  ;;  %v228_v2 = vld [vmem:[%s835_s4 + $0x1f0] sm:$0xff] }
  0x4f   : > { %v340_v38 = vmin.f32 %v338_v14, %v339_v27  ;;  %v345_v44 = vrot.slane %v344_v32, 2  ;;  %v275_v47 = vmin.f32 %v274_v37, %v218_v28  ;;  %v355_v50 = vrot.slane %v257_v36, 4  ;;  %v221_v61 = vld [vmem:[%s835_s4 + $0x1b8] sm:$0xff] }
  0x50   : > { %v264_v52 = vmin.f32 %v263_v41, %v205_v33  ;;  %v270_v53 = vmin.f32 %v269_v42, %v212_v34  ;;  %v281_v54 = vmin.f32 %v280_v43, %v225_v35  ;;  %v351_v59 = vrot.slane %v350_v49, 2  ;;  %v229_v10 = vld [vmem:[%s835_s4 + $0x1f8] sm:$0xff] }
  0x51   : > { %v341_v48 = vrot.slane %v340_v38, 1  ;;  %v346_v55 = vmin.f32 %v344_v32, %v345_v44  ;;  %v276_v57 = vmin.f32 %v275_v47, %v219_v40  ;;  %v356_v60 = vmin.f32 %v257_v36, %v355_v50 }
  0x52   : > { %v271_v62 = vmin.f32 %v270_v53, %v213_v45  ;;  %v282_v63 = vmin.f32 %v281_v54, %v226_v46  ;;  %v361_v1 = vrot.slane %v264_v52, 4  ;;  %v352_v4 = vmin.f32 %v350_v49, %v351_v59 }
  0x53   : > { %v342_v58 = vmin.f32 %v340_v38, %v341_v48  ;;  %v347_v0 = vrot.slane %v346_v55, 1  ;;  %v277_v3 = vmin.f32 %v276_v57, %v220_v51  ;;  %v357_v5 = vrot.slane %v356_v60, 2 }
  0x54   : > { %v283_v6 = vmin.f32 %v282_v63, %v227_v56  ;;  %v362_v8 = vmin.f32 %v264_v52, %v361_v1  ;;  %v367_v9 = vrot.slane %v271_v62, 4  ;;  %v353_v12 = vrot.slane %v352_v4, 1 }
  0x55   : > { %v348_v7 = vmin.f32 %v346_v55, %v347_v0  ;;  %v278_v11 = vmin.f32 %v277_v3, %v221_v61  ;;  %v358_v13 = vmin.f32 %v356_v60, %v357_v5 }
  0x56   : > { %v284_v14 = vmin.f32 %v283_v6, %v228_v2  ;;  %v363_v15 = vrot.slane %v362_v8, 2  ;;  %v368_v16 = vmin.f32 %v271_v62, %v367_v9  ;;  %v354_v18 = vmin.f32 %v352_v4, %v353_v12 }
  0x57   : > { %v394_v17 = vsel %vm393_vm0, %v348_v7, %v342_v58  ;;  %v359_v19 = vrot.slane %v358_v13, 1  ;;  %v373_v20 = vrot.slane %v278_v11, 4 }
  0x58   : > { %v285_v21 = vmin.f32 %v284_v14, %v229_v10  ;;  %v364_v22 = vmin.f32 %v362_v8, %v363_v15  ;;  %v369_v23 = vrot.slane %v368_v16, 2  ;;  %v396_v26 = vsel %vm395_vm1, %v354_v18, %v394_v17 }
  0x59   : > { %v360_v24 = vmin.f32 %v358_v13, %v359_v19  ;;  %v374_v25 = vmin.f32 %v278_v11, %v373_v20 }
  0x5a   : > { %v365_v27 = vrot.slane %v364_v22, 1  ;;  %v370_v28 = vmin.f32 %v368_v16, %v369_v23  ;;  %v379_v29 = vrot.slane %v285_v21, 4 }
  0x5b   : > { %v375_v30 = vrot.slane %v374_v25, 2  ;;  %v398_v31 = vsel %vm397_vm2, %v360_v24, %v396_v26 }
  0x5c   : > { %v366_v32 = vmin.f32 %v364_v22, %v365_v27  ;;  %v371_v33 = vrot.slane %v370_v28, 1  ;;  %v380_v34 = vmin.f32 %v285_v21, %v379_v29 }
  0x5d   : > { %v376_v35 = vmin.f32 %v374_v25, %v375_v30 }
  0x5e   : > { %v372_v36 = vmin.f32 %v370_v28, %v371_v33  ;;  %v381_v37 = vrot.slane %v380_v34, 2  ;;  %v400_v38 = vsel %vm399_vm3, %v366_v32, %v398_v31 }
  0x5f   : > { %v377_v39 = vrot.slane %v376_v35, 1 }
  0x60   : > { %v382_v40 = vmin.f32 %v380_v34, %v381_v37  ;;  %v402_v41 = vsel %vm401_vm4, %v372_v36, %v400_v38 }
  0x61   : > { %v378_v42 = vmin.f32 %v376_v35, %v377_v39 }
  0x62   : > { %v383_v43 = vrot.slane %v382_v40, 1 }
  0x63   : > { %v404_v44 = vsel %vm403_vm5, %v378_v42, %v402_v41 }
  0x64   : > { %v384_v45 = vmin.f32 %v382_v40, %v383_v43 }
  0x66   : > { %v406_v46 = vsel %vm405_vm6, %v384_v45, %v404_v44 }
  0x67   : > { %408 = vst [vmem:[%s163_s27] sm:$0xff] %v406_v46 }
  0x68   : > { %634 = shalt.err (!%p631_p5)
}
  0x69   : > { %s635_s22 = scalar_lea.hbm %s912_s12, 128  ;;  %s639_s25 = scalar_lea.hbm %s960_s1, 256 }
  0x6a   : > { %p636_p4 = scmp.ne.s32.totalorder %s912_s12, %s635_s22  ;;  %p640_p12 = scmp.lt.u32.totalorder %s912_s12, %s960_s1 }
  0x6b   : > { %p641_p1 = scmp.lt.u32.totalorder %s639_s25, %s635_s22  ;;  %p643_p8 = scmp.lt.u32.totalorder %s635_s22, %s912_s12 }
  0x6c   : > { %p637_p7 = pnand %p636_p4, %p968_p9 }
  0x6d   : > { %p642_p3 = por %p641_p1, %p640_p12 }
  0x6e   : > { %p638_p10 = pneg %p637_p7 }
  0x6f   : > { %p644_p11 = por %p643_p8, %p642_p3 }
  0x71   : > { %p645_p0 = pnand %p644_p11, %p638_p10 }
  0x73   : > { %648 = shalt.err (!%p645_p0)
}
  0x74   : > { %529 = dma.vmem_to_hbm [thread:$0]  (%p968_p9), %s907_s29, 128, %s912_s12, %s410_s13  }
  0x75 PF: > { %s436_s3 = sand.u32 1, %s683_s6   ;;  %p969_p6 = scmp.ne.s32.totalorder %s965_s21, 0 }
  0x76   : > { %p970_p13 = scmp.ge.s32.totalorder %s703_s11, 2  ;;  %s437_s4 = scalar_lea.sflag [#allocation5], %s436_s3 }
  0x78   : > { %p536_p2 = pnand %p970_p13, %p969_p6 }
  0x7a   : > { %678 = dma.done.wait (!%p536_p2), %s437_s4, 128  }
  0x7b   : > { %680 = vsyncadd (!%p536_p2), %s437_s4, 4294967168  ;;  %s17_s11 = sadd.s32 1, %s703_s11   ;;  %s971_s6 = smov %s687_s7 }
  0x7c   : > { %p14_p5 = scmp.ge.s32.totalorder %s17_s11, 4   ;;  %s972_s7 = smov %s691_s8 }
  0x7d   : > { %s973_s8 = smov %s775_s20  ;;  %s974_s9 = smov %s699_s10 }
  0x7e   : > { %s975_s10 = smov %s977_s14  ;;  %16 = sbr.rel (!%p14_p5) target bundleno = 6 (0x6), region = 81 }
  0x85   :  { %442 = vsyncpa [#allocation4], 1 }
  0x86   :  { %444 = vsyncpa [#allocation4 + $0x1], 1 }
  0x87   :  { %445 = vsyncpa [#allocation5], 1 }
  0x88   :  { %447 = vsyncpa [#allocation5 + $0x1], 1 }

</bundles_post_ra>
